<compile_context>
chip_gen: v6e
topology: v6e:2x2x1
jax: 0.10.0
libtpu: 0.0.40
codegen_flags: <defaults>
</compile_context>

<pallas_src>
import math

import jax
import jax.numpy as jnp
from jax.experimental import pallas as pl
from jax.experimental.pallas import tpu as pltpu

_LANE = 128
_SUBLANE = 8
_MIN_KERNEL_BYTES = 1 << 20  # below this, a fused XLA add beats a standalone pallas_call


def build_positional_encoding(channel, joint_num, time_len, domain):
    """Reproduce the PyTorch __init__ pe buffer construction exactly (float32)."""
    if domain == "temporal":
        # position index = t for every (t, j) pair
        pos = jnp.repeat(jnp.arange(time_len, dtype=jnp.float32), joint_num)
    elif domain == "spatial":
        # position index = j for every (t, j) pair
        pos = jnp.tile(jnp.arange(joint_num, dtype=jnp.float32), time_len)
    else:
        raise ValueError(f"unknown domain {domain!r}")

    position = pos[:, None]  # (T*V, 1)
    div_term = jnp.exp(
        jnp.arange(0, channel, 2, dtype=jnp.float32) * -(math.log(10000.0) / channel)
    )  # (ceil(C/2),)

    pe = jnp.zeros((time_len * joint_num, channel), dtype=jnp.float32)
    pe = pe.at[:, 0::2].set(jnp.sin(position * div_term))
    pe = pe.at[:, 1::2].set(jnp.cos(position * div_term[: channel // 2]))

    # (T*V, C) -> (T, V, C) -> (C, T, V) -> (1, C, T, V)
    return pe.reshape(time_len, joint_num, channel).transpose(2, 0, 1)[None]


def prepare_pe_flat(pe, T):
    """One-time (per T) preprocessing: slice to :T and flatten to a lane-dense (1, C*T*V) f32 row.

    Hoisted out of the forward path: the :T slice is non-contiguous, so doing it
    per call would materialize a fresh copy of pe on every forward.
    """
    pe_sliced = pe[:, :, :T, :]
    _, C, _, V = pe_sliced.shape
    return pe_sliced.reshape(1, C * T * V).astype(jnp.float32)


def _pe_add_kernel(x_ref, pe_ref, o_ref):
    # (TILE_N, TILE_F) + (1, TILE_F): cheap sublane broadcast on the VPU.
    # Add in f32 (pe is f32) to match PyTorch's promotion; cast on store.
    # Free on a DMA-bound kernel.
    o_ref[...] = (x_ref[...].astype(jnp.float32) + pe_ref[...]).astype(o_ref.dtype)


def _round_up(x, m):
    return ((x + m - 1) // m) * m


def _tile_budget_bytes():
    """Per-buffer tile budget, gated by generation.

    v7x (64 MiB VMEM/TC, 3.2 TB/s HBM) wants ~8 MiB steps so the ~0.35 us per-step
    overhead stays small; v5e/v6e are already near roofline at ~2-4 MiB.
    """
    try:
        vmem = int(pltpu.get_tpu_info().vmem_capacity_bytes)
    except Exception:
        vmem = 128 << 20
    if vmem <= (64 << 20):
        return 8 << 20   # v7x
    return 4 << 20       # v5e / v6e


def _select_tiles(N, F, itemsize, budget_bytes):
    """Pick (TILE_N, TILE_F) for the flattened (N, F) broadcast-add.

    Fixed tiles + pl.cdiv grid (ragged last blocks are masked by Pallas), so any
    (N, F) is handled without VMEM blow-ups. Full-row tiles (TILE_F == F) are
    preferred: fully contiguous DMAs and pe fetched once per row band.
    """
    row_bytes = F * itemsize
    if F <= _LANE or row_bytes * _SUBLANE <= budget_bytes:
        tile_f = F  # full-dim block: always legal, fully contiguous DMA
        if N <= _SUBLANE:
            tile_n = N  # full-dim block
            # Grid would otherwise be a single step: split columns so both v7x
            # TensorCores get work.
            if F >= 2 * _LANE:
                tile_f = _round_up(pl.cdiv(F, 2), _LANE)
        else:
            rows = max(_SUBLANE, (budget_bytes // row_bytes) // _SUBLANE * _SUBLANE)
            tile_n = int(min(rows, _round_up(N, _SUBLANE)))
            # Keep >= 2 grid steps along the row ("parallel") axis for megacore.
            if pl.cdiv(N, tile_n) < 2:
                tile_n = max(_SUBLANE, _round_up(pl.cdiv(N, 2), _SUBLANE))
    else:
        # A single row band is too large: split columns (128-aligned); the
        # ragged last column block is masked by the cdiv grid.
        tile_n = N if N <= _SUBLANE else min(_round_up(N, _SUBLANE), 64)
        cols = max(_LANE, (budget_bytes // (tile_n * itemsize)) // _LANE * _LANE)
        tile_f = int(min(cols, _round_up(F, _LANE)))
    return tile_n, tile_f


def positional_encoding_forward(x, pe_flat, *, use_kernel=None):
    """x: (N, C, T, V); pe_flat: (1, C*T*V) float32 from prepare_pe_flat()."""
    N, C, T, V = x.shape
    F = C * T * V
    assert pe_flat.shape == (1, F), (pe_flat.shape, (1, F))

    itemsize = jnp.dtype(x.dtype).itemsize
    if use_kernel is None:
        use_kernel = N * F * itemsize >= _MIN_KERNEL_BYTES
    if not use_kernel:
        # Tiny activation: let XLA fuse the add with neighboring ops instead of
        # paying a standalone pallas_call launch.
        y = x.reshape(N, F).astype(jnp.float32) + pe_flat
        return y.astype(x.dtype).reshape(N, C, T, V)

    # Lane-dense layout: flatten so the lane axis spans C*T*V.
    x2 = x.reshape(N, F)

    budget = _tile_budget_bytes()
    tile_n, tile_f = _select_tiles(N, F, itemsize, budget)
    grid = (pl.cdiv(N, tile_n), pl.cdiv(F, tile_f))

    # Scoped-VMEM limit covering double-buffered x, out and pe tiles, with
    # headroom.  Raises v5e's 16 MiB default when needed, stays well under
    # v7x's 64 MiB physical.
    tile_x_bytes = tile_n * tile_f * itemsize
    tile_pe_bytes = tile_f * 4
    live = 2 * (2 * tile_x_bytes + tile_pe_bytes)
    vmem_limit = int(min(max(live * 5 // 4 + (2 << 20), 16 << 20), 40 << 20))

    cost = pl.CostEstimate(
        flops=N * F,                                   # one add per element
        transcendentals=0,
        bytes_accessed=2 * N * F * itemsize + F * 4,   # read x + write out + read pe once
    )

    out2 = pl.pallas_call(
        _pe_add_kernel,
        out_shape=jax.ShapeDtypeStruct((N, F), x.dtype),
        grid_spec=pltpu.PrefetchScalarGridSpec(
            num_scalar_prefetch=0,
            grid=grid,
            in_specs=[
                # x: one (tile_n, tile_f) tile per grid step.
                pl.BlockSpec((tile_n, tile_f), lambda i, j: (i, j)),
                # pe: broadcast over the row axis (constant block index 0).
                pl.BlockSpec((1, tile_f), lambda i, j: (0, j)),
            ],
            out_specs=pl.BlockSpec((tile_n, tile_f), lambda i, j: (i, j)),
        ),
        compiler_params=pltpu.CompilerParams(
            dimension_semantics=("parallel", "parallel"),
            vmem_limit_bytes=vmem_limit,
        ),
        cost_estimate=cost,
    )(x2, pe_flat)

    return out2.reshape(N, C, T, V)


if __name__ == "__main__":
    # Small shapes consistent with the module: batch=2, channel=4, time=16, joints=16
    N, C, T, V = 2, 4, 16, 16
    channel, joint_num, time_len, domain = C, V, T, "spatial"

    key = jax.random.PRNGKey(0)
    x = jax.random.normal(key, (N, C, T, V), dtype=jnp.float32)

    pe = build_positional_encoding(channel, joint_num, time_len, domain)
    pe_flat = prepare_pe_flat(pe, T)  # hoisted one-time preprocessing ("module init")

    # Force the Pallas path so the kernel itself is exercised even at this tiny
    # demo size (production sizes take it automatically via the byte threshold).
    out = positional_encoding_forward(x, pe_flat, use_kernel=True)
    out = jax.block_until_ready(out)

    # Correctness check against the pure-JAX reference of the forward pass.
    ref = x + pe[:, :, :T, :]
    assert out.shape == x.shape and out.dtype == x.dtype
    assert jnp.allclose(out, ref, atol=1e-6), "mismatch vs reference"

    print("KERNEL_OK")
</pallas_src>

<mosaic_0001>
module attributes {stable_mosaic.version = 11 : i64} {
  func.func @_pe_add_kernel(%arg0: i32, %arg1: i32, %arg2: memref<2x512xf32, #tpu.memory_space<vmem>>, %arg3: memref<1x512xf32, #tpu.memory_space<vmem>>, %arg4: memref<2x512xf32, #tpu.memory_space<vmem>>) attributes {dimension_semantics = [#tpu.dimension_semantics<parallel>, #tpu.dimension_semantics<parallel>], iteration_bounds = array<i64: 1, 2>, scalar_prefetch = 0 : i64, scratch_operands = 0 : i64, tpu.core_type = #tpu.core_type<tc>, window_params = [{transform_indices = @transform_0, window_bounds = array<i64: 2, 512>}, {transform_indices = @transform_1, window_bounds = array<i64: 1, 512>}, {transform_indices = @transform_2, window_bounds = array<i64: 2, 512>}]} {
    %c0 = arith.constant 0 : index
    %c0_0 = arith.constant 0 : index
    %0 = vector.load %arg2[%c0, %c0_0] : memref<2x512xf32, #tpu.memory_space<vmem>>, vector<2x512xf32>
    %c0_1 = arith.constant 0 : index
    %c0_2 = arith.constant 0 : index
    %1 = vector.load %arg3[%c0_1, %c0_2] : memref<1x512xf32, #tpu.memory_space<vmem>>, vector<1x512xf32>
    %2 = vector.broadcast %1 : vector<1x512xf32> to vector<2x512xf32>
    %3 = arith.addf %0, %2 : vector<2x512xf32>
    %c0_3 = arith.constant 0 : index
    %c0_4 = arith.constant 0 : index
    %4 = vector.load %arg4[%c0_3, %c0_4] : memref<2x512xf32, #tpu.memory_space<vmem>>, vector<2x512xf32>
    tpu.vector_store %arg4[%c0_3, %c0_4], %3 {strides = array<i32>} : memref<2x512xf32, #tpu.memory_space<vmem>>, vector<2x512xf32>,
    return
  }
  func.func @transform_0(%arg0: i32, %arg1: i32) -> (i32, i32) {
    %c0_i32 = arith.constant 0 : i32
    return %arg0, %arg1 : i32, i32
  }
  func.func @transform_1(%arg0: i32, %arg1: i32) -> (i32, i32) {
    %c0_i32 = arith.constant 0 : i32
    %c0_i32_0 = arith.constant 0 : i32
    return %c0_i32, %arg1 : i32, i32
  }
  func.func @transform_2(%arg0: i32, %arg1: i32) -> (i32, i32) {
    %c0_i32 = arith.constant 0 : i32
    return %arg0, %arg1 : i32, i32
  }
}

</mosaic_0001>

<bundles_post_ra>
// kernel: tpu_custom_call.1
= control target key start
LH: loop header
LB: loop body
LE: loop exit
PB: predicated region body
PF: predicated region fallthrough
CT: control target
= control target key end

     0   :  { %7 = vsyncpa [#allocation3], 0  ;;  %s801_s0 = inlined_call_operand.hbm [shape: f32[2,1024], index: 0, kind: input, shape index: {}]   ;;  %s802_s1 = inlined_call_operand.hbm [shape: f32[1,1024], index: 1, kind: input, shape index: {}]   ;;  %s803_s2 = inlined_call_operand.hbm [shape: f32[2,1024], index: 2, kind: output, shape index: {}]  }
   0x1   :  { %9 = vsyncpa [#allocation3 + $0x1], 0 }
   0x2   :  { %10 = vsyncpa [#allocation6], 0 }
   0x3   :  { %12 = vsyncpa [#allocation6 + $0x1], 0 }
   0x4   :  { %13 = vsyncpa [#allocation4], 0 }
   0x5   :  { %15 = vsyncpa [#allocation4 + $0x1], 0  ;;  %s633_s9 = smov 0   ;;  %s635_s10 = smov 0  }
   0x6   :  { %s637_s11 = smov 0   ;;  %s639_s12 = smov 0  }
   0x7   :  { %s641_s13 = smov 0   ;;  %s643_s14 = smov 0  }
   0x8 LB: > { %s382_s15 = sadd.s32 4294967295, %s612_s14   ;;  %s383_s16 = sadd.s32 4294967294, %s612_s14   ;;  %s612_s14 = sphi %s643_s14, %s21_s14   ;;  %s608_s13 = sphi %s641_s13, %s815_s13   ;;  %s604_s12 = sphi %s639_s12, %s814_s12   ;;  %s600_s11 = sphi %s637_s11, %s813_s11   ;;  %s596_s10 = sphi %s635_s10, %s812_s10   ;;  %s592_s9 = sphi %s633_s9, %s811_s9  }
   0x9   : > { %s30_s17 = sadd.s32 1, %s608_s13  ;;  %s42_s18 = sadd.s32 1, %s600_s11 }
   0xa   : > { %p31_p0 = scmp.ge.s32.totalorder %s30_s17, 2  ;;  %p49_p1 = scmp.ne.s32.totalorder %s600_s11, %s596_s10 }
   0xb   : > { %p50_p2 = scmp.eq.s32.totalorder %s612_s14, 0  ;;  %p55_p3 = scmp.ne.s32.totalorder %s596_s10, %s592_s9 }
   0xc   : > { %s817_s17 = smov (%p31_p0, %s30_s17), 0  ;;  %p56_p5 = scmp.eq.s32.totalorder %s382_s15, 0 }
   0xd   : > { %p674_p4 = por %p50_p2, %p49_p1  ;;  %s38_s20 = ssub.s32 %s608_s13, %s817_s17 }
   0xe   : > { %p107_p6 = scmp.eq.s32.totalorder %s382_s15, 1  ;;  %p40_p7 = scmp.eq.s32.totalorder %s38_s20, 0 }
   0xf   : > { %p680_p8 = por %p56_p5, %p55_p3  ;;  %p113_p10 = scmp.eq.s32.totalorder %s383_s16, 1 }
  0x10   : > { %p684_p9 = por %p107_p6, %p49_p1  ;;  %p421_p13 = scmp.lt.s32.totalorder %s612_s14, 2 }
  0x11   : > { %s689_s23 = scalar_select %p40_p7, %s600_s11, %s42_s18  }
  0x12   : > { %p691_p11 = por %p113_p10, %p55_p3  ;;  %s698_s25 = sand.u32 1, %s600_s11  }
  0x13   : > { %s386_s26 = sshll.u32 %s698_s25, 3  ;;  %s401_s27 = sshll.u32 %s608_s13, 7 }
  0x14   : > { %s145_s30 = scalar_lea.hbm %s801_s0, %s401_s27  ;;  %s137_s3 = scalar_lea.vmem [#allocation2], %s386_s26 }
  0x15   : > { %s147_s4 = sshll.u32 %s137_s3, 4  ;;  %p707_p0 = pnand %p421_p13, %p674_p4  ;;  %s148_s4 = int_to_ptr.vmem [resolvable:$true] %s147_s4 }
  0x16   : > { %p392_p1 = scmp.ge.s32.totalorder %s612_s14, 1  ;;  %p171_p2 = scmp.lt.s32.totalorder %s612_s14, 3 }
  0x17   : > { %s134_s6 = scalar_lea.sflag [#allocation3], %s698_s25  ;;  %p474_p3 = pneg %p707_p0 }
  0x18   : > { %s485_s7 = scalar_lea.vmem %s148_s4, 128  ;;  %s614_s8 = smov [#allocation2]  }
  0x19   : > { %p486_p5 = scmp.ne.s32.totalorder %s148_s4, %s485_s7  ;;  %s490_s15 = sshll.u32 %s614_s8, 4  ;;  %s491_s15 = int_to_ptr.vmem [resolvable:$false] %s490_s15 }
  0x1a   : > { %s492_s16 = scalar_lea.vmem %s491_s15, 256  ;;  %p493_p4 = scmp.lt.s32.totalorder %s148_s4, %s491_s15 }
  0x1b   : > { %p488_p6 = pnand %p486_p5, %p474_p3  ;;  %p494_p10 = scmp.lt.s32.totalorder %s492_s16, %s485_s7 }
  0x1d   : > { %p489_p7 = pneg %p488_p6  ;;  %p495_p13 = por %p494_p10, %p493_p4 }
  0x1f   : > { %p496_p12 = pnand %p495_p13, %p489_p7 }
  0x21   : > { %499 = shalt.err (!%p496_p12)
}
  0x22   : > { %413 = dma.hbm_to_vmem [thread:$0]  (!%p707_p0), %s145_s30, 128, %s148_s4, %s134_s6  }
  0x23   : > { %p725_p5 = pnand %p392_p1, %p171_p2  ;;  %s389_s19 = sshll.u32 %s698_s25, 2 }
  0x24   : > { %s402_s20 = sshll.u32 %s608_s13, 6  ;;  %s158_s29 = scalar_lea.vmem [#allocation5], %s389_s19 }
  0x25   : > { %s164_s28 = scalar_lea.hbm %s802_s1, %s402_s20  ;;  %s166_s3 = sshll.u32 %s158_s29, 4  ;;  %s167_s3 = int_to_ptr.vmem [resolvable:$true] %s166_s3 }
  0x26   : > { %s155_s7 = scalar_lea.sflag [#allocation6], %s698_s25  ;;  %s513_s8 = scalar_lea.vmem %s167_s3, 64 }
  0x27   : > { %p514_p12 = scmp.ne.s32.totalorder %s167_s3, %s513_s8  ;;  %s615_s30 = smov [#allocation5]  }
  0x28   : > { %s518_s4 = sshll.u32 %s615_s30, 4  ;;  %s519_s4 = int_to_ptr.vmem [resolvable:$false] %s518_s4 }
  0x29   : > { %p516_p6 = pnand %p514_p12, %p474_p3  ;;  %s520_s6 = scalar_lea.vmem %s519_s4, 128 }
  0x2a   : > { %p521_p1 = scmp.lt.s32.totalorder %s167_s3, %s519_s4  ;;  %p522_p2 = scmp.lt.s32.totalorder %s520_s6, %s513_s8 }
  0x2b   : > { %p517_p7 = pneg %p516_p6 }
  0x2c   : > { %p523_p4 = por %p522_p2, %p521_p1 }
  0x2e   : > { %p524_p10 = pnand %p523_p4, %p517_p7 }
  0x30   : > { %527 = shalt.err (!%p524_p10)
}
  0x31   : > { %416 = dma.hbm_to_vmem [thread:$0]  (!%p707_p0), %s164_s28, 64, %s167_s3, %s155_s7  }
  0x32   : > { %175 = sbr.rel (%p725_p5) target bundleno = 88 (0x58), region = 28  ;;  %s743_s25 = sand.u32 (!%p725_p5), 1, %s596_s10  }
  0x33   : > { %s393_s15 = sshll.u32 (!%p725_p5), %s743_s25, 3  ;;  %s178_s16 = scalar_lea.sflag (!%p725_p5), [#allocation3], %s743_s25 }
  0x34   : > { %s181_s19 = scalar_lea.vmem (!%p725_p5), [#allocation2], %s393_s15 }
  0x37   : > { %579 = dma.done.wait (%p680_p8), %s178_s16, 128  }
  0x38   : > { %581 = vsyncadd (%p680_p8), %s178_s16, 4294967168  ;;  %s394_s5 = sshll.u32 %s743_s25, 2  ;;  %s187_s18 = scalar_lea.sflag [#allocation6], %s743_s25 }
  0x39   : > { %s190_s20 = scalar_lea.vmem [#allocation5], %s394_s5 }
  0x3a   : > { %583 = dma.done.wait (%p680_p8), %s187_s18, 64  }
  0x3b   : > { %585 = vsyncadd (%p680_p8), %s187_s18, 4294967232  ;;  %v222_v0 = vlaneseq  ;;  %v616_v1 = vmov 1983009808   ;;  %v220_v9 = vld [vmem:[%s190_s20] sm:$0xf]  ;;  %v219_v19 = vld [vmem:[%s181_s19] sm:$0xff] }
  0x3c   : > { %v241_v2 = vunpack.c.l.s4 %v616_v1  ;;  %s215_s21 = scalar_lea.vmem [#allocation7], %s393_s15  ;;  %s403_s27 = sshll.u32 %s604_s12, 7 }
  0x3d   : > { %v223_v3 = vshrl.u32 %v222_v0, 7  ;;  %s275_s26 = sshll.u32 %s215_s21, 4  ;;  %s273_s3 = scalar_lea.hbm %s803_s2, %s403_s27  ;;  %s276_s26 = int_to_ptr.vmem [resolvable:$true] %s275_s26 }
  0x3e   : > { %v242_v4 = vunpack.c.0.s8 %v241_v2  ;;  %s259_s7 = scalar_lea.sflag [#allocation4], %s743_s25  ;;  %s528_s8 = scalar_lea.vmem %s276_s26, 128 }
  0x3f   : > { %v224_v5 = vsub.s32 0, %v223_v3  ;;  %v228_v6 = vsub.s32 1, %v223_v3  ;;  %v232_v7 = vsub.s32 2, %v223_v3  ;;  %v236_v8 = vsub.s32 3, %v223_v3  ;;  %p529_p8 = scmp.ne.s32.totalorder %s276_s26, %s528_s8  ;;  %s617_s30 = smov [#allocation7]  }
  0x40   : > { %v245_v10 = vsub.s32 %v242_v4, %v223_v3  ;;  %s532_s4 = sshll.u32 %s617_s30, 4  ;;  %s533_s4 = int_to_ptr.vmem [resolvable:$false] %s532_s4 }
  0x41   : > { %v225_v11 = vrot.slane %v220_v9, %v224_v5  ;;  %v229_v12 = vrot.slane %v220_v9, %v228_v6  ;;  %v233_v13 = vrot.slane %v220_v9, %v232_v7  ;;  %v237_v14 = vrot.slane %v220_v9, %v236_v8  ;;  %p530_p0 = pnand %p529_p8, %p684_p9  ;;  %s534_s6 = scalar_lea.vmem %s533_s4, 256 }
  0x42   : > { %p535_p13 = scmp.lt.s32.totalorder %s276_s26, %s533_s4  ;;  %p536_p5 = scmp.lt.s32.totalorder %s534_s6, %s528_s8 }
  0x43   : > { %v238_v15 = vcombine.low %v225_v11, %v229_v12  ;;  %v239_v16 = vcombine.low %v233_v13, %v237_v14  ;;  %p531_p3 = pneg %p530_p0 }
  0x44   : > { %p537_p12 = por %p536_p5, %p535_p13 }
  0x45   : > { %v246_v17 = vrot.slane %v238_v15, %v245_v10  ;;  %v253_v18 = vrot.slane %v239_v16, %v245_v10 }
  0x46   : > { %p538_p6 = pnand %p537_p12, %p531_p3 }
  0x47   : > { %v254_v20 = vcombine.low %v246_v17, %v253_v18 }
  0x49   : > { %v256_v21 = vadd.f32 %v254_v20, %v219_v19 }
  0x4b   : > { %257 = vst [vmem:[%s215_s21] sm:$0xff] %v256_v21 }
  0x4c   : > { %541 = shalt.err (!%p538_p6)
}
  0x4d   : > { %s542_s12 = scalar_lea.hbm %s273_s3, 128  ;;  %s546_s16 = scalar_lea.hbm %s803_s2, 256 }
  0x4e   : > { %p543_p7 = scmp.ne.s32.totalorder %s273_s3, %s542_s12  ;;  %p547_p4 = scmp.lt.s32.totalorder %s273_s3, %s803_s2 }
  0x4f   : > { %p548_p10 = scmp.lt.s32.totalorder %s546_s16, %s542_s12 }
  0x50   : > { %p544_p1 = pnand %p543_p7, %p684_p9 }
  0x51   : > { %p549_p8 = por %p548_p10, %p547_p4 }
  0x52   : > { %p545_p2 = pneg %p544_p1 }
  0x54   : > { %p550_p0 = pnand %p549_p8, %p545_p2 }
  0x56   : > { %553 = shalt.err (!%p550_p0)
}
  0x57   : > { %408 = dma.vmem_to_hbm [thread:$0]  (%p684_p9), %s276_s26, 128, %s273_s3, %s259_s7  }
  0x58 PF: > { %s287_s18 = sand.u32 1, %s592_s9   ;;  %p810_p3 = scmp.ge.s32.totalorder %s612_s14, 2 }
  0x59   : > { %s288_s20 = scalar_lea.sflag [#allocation4], %s287_s18 }
  0x5a   : > { %p418_p13 = pnand %p810_p3, %p691_p11 }
  0x5c   : > { %p419_p5 = pneg %p418_p13 }
  0x5e   : > { %587 = dma.done.wait (%p419_p5), %s288_s20, 128  }
  0x5f   : > { %589 = vsyncadd (%p419_p5), %s288_s20, 4294967168  ;;  %s21_s14 = sadd.s32 1, %s612_s14   ;;  %s811_s9 = smov %s596_s10 }
  0x60   : > { %p18_p12 = scmp.ge.s32.totalorder %s21_s14, 4   ;;  %s812_s10 = smov %s600_s11 }
  0x61   : > { %s813_s11 = smov %s689_s23  ;;  %s814_s12 = smov %s608_s13 }
  0x62   : > { %s815_s13 = smov %s817_s17  ;;  %20 = sbr.rel (!%p18_p12) target bundleno = 8 (0x8), region = 86 }
  0x67   :  { %293 = vsyncpa [#allocation3], 1 }
  0x68   :  { %295 = vsyncpa [#allocation3 + $0x1], 1 }
  0x69   :  { %296 = vsyncpa [#allocation6], 1 }
  0x6a   :  { %298 = vsyncpa [#allocation6 + $0x1], 1 }
  0x6b   :  { %299 = vsyncpa [#allocation4], 1 }
  0x6c   :  { %301 = vsyncpa [#allocation4 + $0x1], 1 }

</bundles_post_ra>
